<compile_context>
chip_gen: v7x
topology: tpu7x:2x2x1
jax: 0.10.0
libtpu: 0.0.40
codegen_flags: <defaults>
</compile_context>

<pallas_src>
import functools

import jax
import jax.numpy as jnp
from jax.experimental import pallas as pl
from jax.experimental.pallas import tpu as pltpu

D_IN, H1, H2 = 784, 128, 64  # 784 -> 128 -> 64 -> 128 -> 784


def _autoencoder_kernel(x_ref,
                        w1_ref, b1_ref,
                        w2_ref, b2_ref,
                        w3_ref, b3_ref,
                        w4_ref, b4_ref,
                        o_ref):
    """Whole forward pass for one batch tile; all operands resident in VMEM.

    Weights may be bf16 (fast MXU path); accumulation is always f32.
    """
    cdt = w1_ref.dtype                 # MXU operand dtype (bf16 or f32)
    x = x_ref[...].astype(cdt)

    # encoder
    h = jnp.dot(x, w1_ref[...], preferred_element_type=jnp.float32) + b1_ref[...]
    h = jnp.maximum(h, 0.0)
    h = jnp.dot(h.astype(cdt), w2_ref[...], preferred_element_type=jnp.float32) + b2_ref[...]
    h = jnp.maximum(h, 0.0)

    # decoder
    h = jnp.dot(h.astype(cdt), w3_ref[...], preferred_element_type=jnp.float32) + b3_ref[...]
    h = jnp.maximum(h, 0.0)
    h = jnp.dot(h.astype(cdt), w4_ref[...], preferred_element_type=jnp.float32) + b4_ref[...]

    # Sigmoid = 1 / (1 + exp(-h)).
    e = jnp.exp(-h)
    if cdt == jnp.float32:
        # Exact path (parity with jax.nn.sigmoid / the PyTorch reference).
        out = 1.0 / (1.0 + e)
    else:
        # Fast path: exp and approx-reciprocal both land on the EUP slot.
        out = pl.reciprocal(1.0 + e, approx=True)
    o_ref[...] = out.astype(o_ref.dtype)


def _round_up(n, m):
    return -(-n // m) * m


@functools.partial(jax.jit,
                   static_argnames=("batch_tile", "compute_dtype", "out_dtype"))
def autoencoder_forward(x, params, *, batch_tile=512,
                        compute_dtype=jnp.bfloat16, out_dtype=jnp.float32):
    """x: [B, 784] (f32 or bf16) -> [B, 784] out_dtype."""
    B, D = x.shape
    assert D == D_IN
    w1, b1, w2, b2, w3, b3, w4, b4 = params

    # MXU operands in compute_dtype; biases / accumulation stay f32.
    w1, w2, w3, w4 = (w.astype(compute_dtype) for w in (w1, w2, w3, w4))
    b1, b2, b3, b4 = (b.astype(jnp.float32) for b in (b1, b2, b3, b4))

    # --- tile selection -----------------------------------------------------
    # Multiple of 8 sublanes, capped by batch_tile.  No wrapper-side padding:
    # the last grid block may be ragged (rows are independent, so the padded
    # tail rows are dropped on masked writeback).
    tile = min(batch_tile, _round_up(B, 8))
    # v7x megacore only shards the "parallel" axis if the grid has >= 2 steps;
    # when the whole batch fits in one tile and is big enough to split, do so.
    if tile >= _round_up(B, 8) and B >= 512:
        tile = _round_up(-(-B // 2), 8)
    grid = (pl.cdiv(B, tile),)

    # --- VMEM budget (double buffers + weights + f32 intermediates) ---------
    bpe_x = x.dtype.itemsize
    bpe_out = jnp.dtype(out_dtype).itemsize
    w_bytes = sum(a.size * a.dtype.itemsize
                  for a in (w1, b1, w2, b2, w3, b3, w4, b4))
    vmem_bytes = (
        2 * tile * D_IN * bpe_x        # x double buffer
        + 2 * tile * D_IN * bpe_out    # out double buffer
        + 2 * w_bytes                  # weight/bias (grid-invariant) buffers
        + 4 * tile * D_IN * 4          # f32 intermediates of 784-wide layers
        + 8 * 1024 * 1024              # headroom / compiler scratch
    )
    vmem_bytes = int(min(max(vmem_bytes, 16 * 1024 * 1024), 48 * 1024 * 1024))

    # --- cost hint for XLA's scheduler ---------------------------------------
    flops = 2 * B * (D_IN * H1 + H1 * H2 + H2 * H1 + H1 * D_IN)
    cost = pl.CostEstimate(
        flops=flops,
        transcendentals=B * D_IN,
        bytes_accessed=B * D_IN * (bpe_x + bpe_out) + w_bytes,
    )

    def rep(shape):
        # Grid-invariant weight/bias block: same block every step (stays
        # resident; no re-fetch across grid iterations).
        return pl.BlockSpec(shape, lambda i: (0, 0))

    out = pl.pallas_call(
        _autoencoder_kernel,
        out_shape=jax.ShapeDtypeStruct((B, D_IN), out_dtype),
        grid_spec=pltpu.PrefetchScalarGridSpec(
            num_scalar_prefetch=0,
            grid=grid,
            in_specs=[
                pl.BlockSpec((tile, D_IN), lambda i: (i, 0)),  # x tile
                rep((D_IN, H1)), rep((1, H1)),    # layer 1
                rep((H1, H2)),   rep((1, H2)),    # layer 2
                rep((H2, H1)),   rep((1, H1)),    # layer 3
                rep((H1, D_IN)), rep((1, D_IN)),  # layer 4
            ],
            out_specs=pl.BlockSpec((tile, D_IN), lambda i: (i, 0)),
        ),
        compiler_params=pltpu.CompilerParams(
            dimension_semantics=("parallel",),
            vmem_limit_bytes=vmem_bytes,
        ),
        cost_estimate=cost,
    )(x, w1, b1, w2, b2, w3, b3, w4, b4)

    return out


def init_params(key):
    """PyTorch-style default init: U(-1/sqrt(fan_in), +1/sqrt(fan_in))."""
    dims = [(D_IN, H1), (H1, H2), (H2, H1), (H1, D_IN)]
    params = []
    keys = jax.random.split(key, 2 * len(dims))
    for idx, (fan_in, fan_out) in enumerate(dims):
        bound = 1.0 / jnp.sqrt(fan_in)
        w = jax.random.uniform(keys[2 * idx], (fan_in, fan_out),
                               minval=-bound, maxval=bound, dtype=jnp.float32)
        b = jax.random.uniform(keys[2 * idx + 1], (1, fan_out),
                               minval=-bound, maxval=bound, dtype=jnp.float32)
        params += [w, b]
    return tuple(params)


def _reference_forward(x, params):
    w1, b1, w2, b2, w3, b3, w4, b4 = params
    h = jnp.maximum(x @ w1 + b1, 0.0)
    h = jnp.maximum(h @ w2 + b2, 0.0)
    h = jnp.maximum(h @ w3 + b3, 0.0)
    return jax.nn.sigmoid(h @ w4 + b4)


if __name__ == "__main__":
    key = jax.random.PRNGKey(0)
    k_param, k_x1, k_x2 = jax.random.split(key, 3)

    params = init_params(k_param)

    # Case 1: default fast path (bf16 MXU operands, f32 accumulation).
    B = 16
    x = jax.random.uniform(k_x1, (B, D_IN), dtype=jnp.float32)
    ref = _reference_forward(x, params)
    out = jax.block_until_ready(autoencoder_forward(x, params))
    assert out.shape == (B, D_IN) and out.dtype == jnp.float32
    assert jnp.allclose(out, ref, atol=3e-2, rtol=0), float(jnp.abs(out - ref).max())

    # Case 2: exact f32 path + ragged batch (B not a multiple of the tile),
    # exercising the masked writeback of the padded tail rows.
    B2 = 19
    x2 = jax.random.uniform(k_x2, (B2, D_IN), dtype=jnp.float32)
    ref2 = _reference_forward(x2, params)
    out2 = jax.block_until_ready(
        autoencoder_forward(x2, params, compute_dtype=jnp.float32))
    assert out2.shape == (B2, D_IN)
    assert jnp.allclose(out2, ref2, atol=2e-3, rtol=0), float(jnp.abs(out2 - ref2).max())

    print("KERNEL_OK")
</pallas_src>

<mosaic_0001>
module attributes {stable_mosaic.version = 11 : i64} {
  func.func @_autoencoder_kernel(%arg0: i32, %arg1: memref<16x784xf32, #tpu.memory_space<vmem>>, %arg2: memref<784x128xbf16, #tpu.memory_space<vmem>>, %arg3: memref<1x128xf32, #tpu.memory_space<vmem>>, %arg4: memref<128x64xbf16, #tpu.memory_space<vmem>>, %arg5: memref<1x64xf32, #tpu.memory_space<vmem>>, %arg6: memref<64x128xbf16, #tpu.memory_space<vmem>>, %arg7: memref<1x128xf32, #tpu.memory_space<vmem>>, %arg8: memref<128x784xbf16, #tpu.memory_space<vmem>>, %arg9: memref<1x784xf32, #tpu.memory_space<vmem>>, %arg10: memref<16x784xf32, #tpu.memory_space<vmem>>) attributes {dimension_semantics = [#tpu.dimension_semantics<parallel>], iteration_bounds = array<i64: 1>, scalar_prefetch = 0 : i64, scratch_operands = 0 : i64, tpu.core_type = #tpu.core_type<tc>, window_params = [{transform_indices = @transform_0, window_bounds = array<i64: 16, 784>}, {pipeline_mode = #tpu.pipeline_mode<synchronous>, transform_indices = @transform_1, window_bounds = array<i64: 784, 128>}, {pipeline_mode = #tpu.pipeline_mode<synchronous>, transform_indices = @transform_2, window_bounds = array<i64: 1, 128>}, {pipeline_mode = #tpu.pipeline_mode<synchronous>, transform_indices = @transform_3, window_bounds = array<i64: 128, 64>}, {pipeline_mode = #tpu.pipeline_mode<synchronous>, transform_indices = @transform_4, window_bounds = array<i64: 1, 64>}, {pipeline_mode = #tpu.pipeline_mode<synchronous>, transform_indices = @transform_5, window_bounds = array<i64: 64, 128>}, {pipeline_mode = #tpu.pipeline_mode<synchronous>, transform_indices = @transform_6, window_bounds = array<i64: 1, 128>}, {pipeline_mode = #tpu.pipeline_mode<synchronous>, transform_indices = @transform_7, window_bounds = array<i64: 128, 784>}, {pipeline_mode = #tpu.pipeline_mode<synchronous>, transform_indices = @transform_8, window_bounds = array<i64: 1, 784>}, {transform_indices = @transform_9, window_bounds = array<i64: 16, 784>}]} {
    %c0 = arith.constant 0 : index
    %c0_0 = arith.constant 0 : index
    %0 = vector.load %arg1[%c0, %c0_0] : memref<16x784xf32, #tpu.memory_space<vmem>>, vector<16x784xf32>
    %1 = arith.truncf %0 : vector<16x784xf32> to vector<16x784xbf16>
    %c0_1 = arith.constant 0 : index
    %c0_2 = arith.constant 0 : index
    %2 = vector.load %arg2[%c0_1, %c0_2] : memref<784x128xbf16, #tpu.memory_space<vmem>>, vector<784x128xbf16>
    %cst = arith.constant dense<0.000000e+00> : vector<16x128xf32>
    %3 = tpu.matmul %1, %2, %cst {dimension_numbers = #tpu.dot_dimension_numbers<[1], [0], [0], [1], [0, 0, 1, 1], [], []>} : vector<16x784xbf16>, vector<784x128xbf16>, vector<16x128xf32> -> vector<16x128xf32>
    %c0_3 = arith.constant 0 : index
    %c0_4 = arith.constant 0 : index
    %4 = vector.load %arg3[%c0_3, %c0_4] : memref<1x128xf32, #tpu.memory_space<vmem>>, vector<1x128xf32>
    %5 = vector.broadcast %4 : vector<1x128xf32> to vector<16x128xf32>
    %6 = arith.addf %3, %5 : vector<16x128xf32>
    %cst_5 = arith.constant 0.000000e+00 : f32
    %7 = vector.broadcast %cst_5 : f32 to vector<16x128xf32>
    %8 = arith.maximumf %6, %7 : vector<16x128xf32>
    %9 = arith.truncf %8 : vector<16x128xf32> to vector<16x128xbf16>
    %c0_6 = arith.constant 0 : index
    %c0_7 = arith.constant 0 : index
    %10 = vector.load %arg4[%c0_6, %c0_7] : memref<128x64xbf16, #tpu.memory_space<vmem>>, vector<128x64xbf16>
    %cst_8 = arith.constant dense<0.000000e+00> : vector<16x64xf32>
    %11 = tpu.matmul %9, %10, %cst_8 {dimension_numbers = #tpu.dot_dimension_numbers<[1], [0], [0], [1], [0, 0, 1, 1], [], []>} : vector<16x128xbf16>, vector<128x64xbf16>, vector<16x64xf32> -> vector<16x64xf32>
    %c0_9 = arith.constant 0 : index
    %c0_10 = arith.constant 0 : index
    %12 = vector.load %arg5[%c0_9, %c0_10] : memref<1x64xf32, #tpu.memory_space<vmem>>, vector<1x64xf32>
    %13 = vector.broadcast %12 : vector<1x64xf32> to vector<16x64xf32>
    %14 = arith.addf %11, %13 : vector<16x64xf32>
    %cst_11 = arith.constant 0.000000e+00 : f32
    %15 = vector.broadcast %cst_11 : f32 to vector<16x64xf32>
    %16 = arith.maximumf %14, %15 : vector<16x64xf32>
    %17 = arith.truncf %16 : vector<16x64xf32> to vector<16x64xbf16>
    %c0_12 = arith.constant 0 : index
    %c0_13 = arith.constant 0 : index
    %18 = vector.load %arg6[%c0_12, %c0_13] : memref<64x128xbf16, #tpu.memory_space<vmem>>, vector<64x128xbf16>
    %cst_14 = arith.constant dense<0.000000e+00> : vector<16x128xf32>
    %19 = tpu.matmul %17, %18, %cst_14 {dimension_numbers = #tpu.dot_dimension_numbers<[1], [0], [0], [1], [0, 0, 1, 1], [], []>} : vector<16x64xbf16>, vector<64x128xbf16>, vector<16x128xf32> -> vector<16x128xf32>
    %c0_15 = arith.constant 0 : index
    %c0_16 = arith.constant 0 : index
    %20 = vector.load %arg7[%c0_15, %c0_16] : memref<1x128xf32, #tpu.memory_space<vmem>>, vector<1x128xf32>
    %21 = vector.broadcast %20 : vector<1x128xf32> to vector<16x128xf32>
    %22 = arith.addf %19, %21 : vector<16x128xf32>
    %cst_17 = arith.constant 0.000000e+00 : f32
    %23 = vector.broadcast %cst_17 : f32 to vector<16x128xf32>
    %24 = arith.maximumf %22, %23 : vector<16x128xf32>
    %25 = arith.truncf %24 : vector<16x128xf32> to vector<16x128xbf16>
    %c0_18 = arith.constant 0 : index
    %c0_19 = arith.constant 0 : index
    %26 = vector.load %arg8[%c0_18, %c0_19] : memref<128x784xbf16, #tpu.memory_space<vmem>>, vector<128x784xbf16>
    %cst_20 = arith.constant dense<0.000000e+00> : vector<16x784xf32>
    %27 = tpu.matmul %25, %26, %cst_20 {dimension_numbers = #tpu.dot_dimension_numbers<[1], [0], [0], [1], [0, 0, 1, 1], [], []>} : vector<16x128xbf16>, vector<128x784xbf16>, vector<16x784xf32> -> vector<16x784xf32>
    %c0_21 = arith.constant 0 : index
    %c0_22 = arith.constant 0 : index
    %28 = vector.load %arg9[%c0_21, %c0_22] : memref<1x784xf32, #tpu.memory_space<vmem>>, vector<1x784xf32>
    %29 = vector.broadcast %28 : vector<1x784xf32> to vector<16x784xf32>
    %30 = arith.addf %27, %29 : vector<16x784xf32>
    %cst_23 = arith.constant 0.000000e+00 : f32
    %31 = vector.broadcast %cst_23 : f32 to vector<16x784xf32>
    %32 = arith.subf %31, %30 : vector<16x784xf32>
    %33 = math.exp %32 : vector<16x784xf32>
    %cst_24 = arith.constant 1.000000e+00 : f32
    %34 = vector.broadcast %cst_24 : f32 to vector<16x784xf32>
    %35 = arith.addf %34, %33 : vector<16x784xf32>
    %36 = tpu.reciprocal %35 {approx = true} : vector<16x784xf32> -> vector<16x784xf32>
    %c0_25 = arith.constant 0 : index
    %c0_26 = arith.constant 0 : index
    %37 = vector.load %arg10[%c0_25, %c0_26] : memref<16x784xf32, #tpu.memory_space<vmem>>, vector<16x784xf32>
    tpu.vector_store %arg10[%c0_25, %c0_26], %36 {strides = array<i32>} : memref<16x784xf32, #tpu.memory_space<vmem>>, vector<16x784xf32>,
    return
  }
  func.func @transform_0(%arg0: i32) -> (i32, i32) {
    %c0_i32 = arith.constant 0 : i32
    %c0_i32_0 = arith.constant 0 : i32
    return %arg0, %c0_i32 : i32, i32
  }
  func.func @transform_1(%arg0: i32) -> (i32, i32) {
    %c0_i32 = arith.constant 0 : i32
    %c0_i32_0 = arith.constant 0 : i32
    %c0_i32_1 = arith.constant 0 : i32
    return %c0_i32, %c0_i32_0 : i32, i32
  }
  func.func @transform_2(%arg0: i32) -> (i32, i32) {
    %c0_i32 = arith.constant 0 : i32
    %c0_i32_0 = arith.constant 0 : i32
    %c0_i32_1 = arith.constant 0 : i32
    return %c0_i32, %c0_i32_0 : i32, i32
  }
  func.func @transform_3(%arg0: i32) -> (i32, i32) {
    %c0_i32 = arith.constant 0 : i32
    %c0_i32_0 = arith.constant 0 : i32
    %c0_i32_1 = arith.constant 0 : i32
    return %c0_i32, %c0_i32_0 : i32, i32
  }
  func.func @transform_4(%arg0: i32) -> (i32, i32) {
    %c0_i32 = arith.constant 0 : i32
    %c0_i32_0 = arith.constant 0 : i32
    %c0_i32_1 = arith.constant 0 : i32
    return %c0_i32, %c0_i32_0 : i32, i32
  }
  func.func @transform_5(%arg0: i32) -> (i32, i32) {
    %c0_i32 = arith.constant 0 : i32
    %c0_i32_0 = arith.constant 0 : i32
    %c0_i32_1 = arith.constant 0 : i32
    return %c0_i32, %c0_i32_0 : i32, i32
  }
  func.func @transform_6(%arg0: i32) -> (i32, i32) {
    %c0_i32 = arith.constant 0 : i32
    %c0_i32_0 = arith.constant 0 : i32
    %c0_i32_1 = arith.constant 0 : i32
    return %c0_i32, %c0_i32_0 : i32, i32
  }
  func.func @transform_7(%arg0: i32) -> (i32, i32) {
    %c0_i32 = arith.constant 0 : i32
    %c0_i32_0 = arith.constant 0 : i32
    %c0_i32_1 = arith.constant 0 : i32
    return %c0_i32, %c0_i32_0 : i32, i32
  }
  func.func @transform_8(%arg0: i32) -> (i32, i32) {
    %c0_i32 = arith.constant 0 : i32
    %c0_i32_0 = arith.constant 0 : i32
    %c0_i32_1 = arith.constant 0 : i32
    return %c0_i32, %c0_i32_0 : i32, i32
  }
  func.func @transform_9(%arg0: i32) -> (i32, i32) {
    %c0_i32 = arith.constant 0 : i32
    %c0_i32_0 = arith.constant 0 : i32
    return %arg0, %c0_i32 : i32, i32
  }
}

</mosaic_0001>

<bundles_post_ra>
// kernel: autoencoder_forward.1
= control target key start
LH: loop header
LB: loop body
LE: loop exit
PB: predicated region body
PF: predicated region fallthrough
CT: control target
= control target key end

     0   :  { %v1984_v43 = vmov 0.0   ;;  %vm1985_vm0 = vmmov 0   ;;  %vm454_vm1 = vcmask 130048   ;;  %s2507_s0 = inlined_call_operand.vmem [shape: f32[16,784], index: 0, kind: input, shape index: {}]   ;;  %s2508_s1 = inlined_call_operand.vmem [shape: bf16[784,128], index: 1, kind: input, shape index: {}]   ;;  %s2509_s2 = inlined_call_operand.vmem [shape: f32[1,128], index: 2, kind: input, shape index: {}]   ;;  %s2510_s3 = inlined_call_operand.vmem [shape: bf16[128,64], index: 3, kind: input, shape index: {}]   ;;  %s2511_s4 = inlined_call_operand.vmem [shape: f32[1,64], index: 4, kind: input, shape index: {}]   ;;  %s2512_s5 = inlined_call_operand.vmem [shape: bf16[64,128], index: 5, kind: input, shape index: {}]   ;;  %s2513_s6 = inlined_call_operand.vmem [shape: f32[1,128], index: 6, kind: input, shape index: {}]   ;;  %s2514_s7 = inlined_call_operand.vmem [shape: bf16[128,784], index: 7, kind: input, shape index: {}]   ;;  %s2515_s8 = inlined_call_operand.vmem [shape: f32[1,784], index: 8, kind: input, shape index: {}]   ;;  %s2516_s9 = inlined_call_operand.hbm [shape: f32[16,784], index: 9, kind: output, shape index: {}]  }
   0x1   :  { %v1763_v0 = vld [vmem:[%s2508_s1 + $0x40] sm:$0xff]   ;;  %v1767_v4 = vld [vmem:[%s2508_s1 + $0x48] sm:$0xff]   ;;  %v1771_v8 = vld [vmem:[%s2508_s1 + $0x50] sm:$0xff]  }
   0x2   :  { %v1764_v1 = vld [vmem:[%s2508_s1] sm:$0xff]   ;;  %1608 = vmatprep.subr.bf16.mxu0 %v1763_v0  ;;  %v1768_v5 = vld [vmem:[%s2508_s1 + $0x8] sm:$0xff]   ;;  %v1772_v9 = vld [vmem:[%s2508_s1 + $0x10] sm:$0xff]  }
   0x3   :  { %v1765_v2 = vld [vmem:[%s2508_s1 + $0xc0] sm:$0xff]   ;;  %1609 = vmatpush3.bf16.msra.mxu0 %v1764_v1  ;;  %v1769_v6 = vld [vmem:[%s2508_s1 + $0xc8] sm:$0xff]   ;;  %v1773_v10 = vld [vmem:[%s2508_s1 + $0xd0] sm:$0xff]  }
   0x4   :  { %v1766_v3 = vld [vmem:[%s2508_s1 + $0x80] sm:$0xff]   ;;  %1630 = vmatprep.subr.bf16.mxu1 %v1765_v2  ;;  %1610 = vmatprep.subr.bf16.mxu0 %v1767_v4  ;;  %v1770_v7 = vld [vmem:[%s2508_s1 + $0x88] sm:$0xff]   ;;  %v1774_v11 = vld [vmem:[%s2508_s1 + $0x90] sm:$0xff]  }
   0x5   :  { %1631 = vmatpush3.bf16.msra.mxu1 %v1766_v3  ;;  %v1775_v12 = vld [vmem:[%s2508_s1 + $0x58] sm:$0xff]   ;;  %v1779_v16 = vld [vmem:[%s2508_s1 + $0x60] sm:$0xff]   ;;  %v1783_v20 = vld [vmem:[%s2508_s1 + $0x68] sm:$0xff]  }
   0x6   :  { %1632 = vmatprep.subr.bf16.mxu1 %v1769_v6  ;;  %v1776_v13 = vld [vmem:[%s2508_s1 + $0x18] sm:$0xff]   ;;  %v1780_v17 = vld [vmem:[%s2508_s1 + $0x20] sm:$0xff]   ;;  %v1784_v21 = vld [vmem:[%s2508_s1 + $0x28] sm:$0xff]  }
   0x7   :  { %1611 = vmatpush3.bf16.msra.mxu0 %v1768_v5  ;;  %v1777_v14 = vld [vmem:[%s2508_s1 + $0xd8] sm:$0xff]   ;;  %v1781_v18 = vld [vmem:[%s2508_s1 + $0xe0] sm:$0xff]   ;;  %v1785_v22 = vld [vmem:[%s2508_s1 + $0xe8] sm:$0xff]  }
   0x8   :  { %1612 = vmatprep.subr.bf16.mxu0 %v1771_v8  ;;  %v1778_v15 = vld [vmem:[%s2508_s1 + $0x98] sm:$0xff]   ;;  %v1782_v19 = vld [vmem:[%s2508_s1 + $0xa0] sm:$0xff]   ;;  %v1786_v23 = vld [vmem:[%s2508_s1 + $0xa8] sm:$0xff]  }
   0x9   :  { %1633 = vmatpush3.bf16.msra.mxu1 %v1770_v7  ;;  %v1787_v24 = vld [vmem:[%s2508_s1 + $0x70] sm:$0xff]   ;;  %v1791_v28 = vld [vmem:[%s2508_s1 + $0x78] sm:$0xff]   ;;  %v35_v31 = vld [vmem:[%s2507_s0 + $0x8] sm:$0xff] }
   0xa   :  { %1634 = vmatprep.subr.bf16.mxu1 %v1773_v10  ;;  %v1788_v25 = vld [vmem:[%s2508_s1 + $0x30] sm:$0xff]   ;;  %v1792_v29 = vld [vmem:[%s2508_s1 + $0x38] sm:$0xff]   ;;  %v42_v32 = vld [vmem:[%s2507_s0 + $0x40] sm:$0xff] }
   0xb   :  { %1613 = vmatpush3.bf16.msra.mxu0 %v1772_v9  ;;  %v1789_v26 = vld [vmem:[%s2508_s1 + $0xf0] sm:$0xff]   ;;  %v1793_v30 = vld [vmem:[%s2508_s1 + $0xf8] sm:$0xff]   ;;  %v49_v33 = vpack.c.bf16 %v42_v32, %v35_v31  ;;  %v34_v35 = vld [vmem:[%s2507_s0] sm:$0xff] }
   0xc   :  { %1614 = vmatprep.subr.bf16.mxu0 %v1775_v12  ;;  %v1790_v27 = vld [vmem:[%s2508_s1 + $0xb0] sm:$0xff]   ;;  %v1794_v34 = vld [vmem:[%s2508_s1 + $0xb8] sm:$0xff]   ;;  %v1795_v38 = vld [vmem:[%s2508_s1 + $0x140] sm:$0xff]  }
   0xd   :  { %1635 = vmatpush3.bf16.msra.mxu1 %v1774_v11  ;;  %v41_v36 = vld [vmem:[%s2507_s0 + $0x38] sm:$0xff]  ;;  %490 = vmatprep.mubr.bf16.mxu0 %v49_v33  ;;  %v44_v40 = vld [vmem:[%s2507_s0 + $0x50] sm:$0xff]  ;;  %v1796_v42 = vld [vmem:[%s2508_s1 + $0x100] sm:$0xff]  }
   0xe   :  { %1636 = vmatprep.subr.bf16.mxu1 %v1777_v14  ;;  %v48_v37 = vpack.c.bf16 %v41_v36, %v34_v35  ;;  %v37_v39 = vld [vmem:[%s2507_s0 + $0x18] sm:$0xff]  ;;  %v36_v44 = vld [vmem:[%s2507_s0 + $0x10] sm:$0xff]  ;;  %v43_v45 = vld [vmem:[%s2507_s0 + $0x48] sm:$0xff] }
   0xf   :  { %1615 = vmatpush3.bf16.msra.mxu0 %v1776_v13  ;;  %v51_v41 = vpack.c.bf16 %v44_v40, %v37_v39  ;;  %v50_v46 = vpack.c.bf16 %v43_v45, %v36_v44  ;;  %v1797_v47 = vld [vmem:[%s2508_s1 + $0x148] sm:$0xff]   ;;  %v1799_v49 = vld [vmem:[%s2508_s1 + $0x150] sm:$0xff]   ;;  %v1801_v51 = vld [vmem:[%s2508_s1 + $0x158] sm:$0xff]  }
  0x10   :  { %1616 = vmatprep.subr.bf16.mxu0 %v1779_v16  ;;  %v1798_v48 = vld [vmem:[%s2508_s1 + $0x108] sm:$0xff]   ;;  %v1800_v50 = vld [vmem:[%s2508_s1 + $0x110] sm:$0xff]   ;;  %v1802_v52 = vld [vmem:[%s2508_s1 + $0x118] sm:$0xff]  }
  0x11   :  { %1637 = vmatpush3.bf16.msra.mxu1 %v1778_v15  ;;  %531 = vmatprep.mubr.bf16.mxu1 %v51_v41  ;;  %v1803_v53 = vld [vmem:[%s2508_s1 + $0x160] sm:$0xff]   ;;  %v1805_v55 = vld [vmem:[%s2508_s1 + $0x168] sm:$0xff]   ;;  %v1807_v59 = vld [vmem:[%s2508_s1 + $0x170] sm:$0xff]  }
  0x12   :  { %1638 = vmatprep.subr.bf16.mxu1 %v1781_v18  ;;  %v1804_v54 = vld [vmem:[%s2508_s1 + $0x120] sm:$0xff]   ;;  %v39_v57 = vld [vmem:[%s2507_s0 + $0x28] sm:$0xff]  ;;  %v40_v62 = vld [vmem:[%s2507_s0 + $0x30] sm:$0xff] }
  0x13   :  { %1617 = vmatpush3.bf16.msra.mxu0 %v1780_v17  ;;  %v1811_v56 = vld [vmem:[%s2508_s1 + $0x180] sm:$0xff]   ;;  %v1806_v58 = vld [vmem:[%s2508_s1 + $0x128] sm:$0xff]   ;;  %v1808_v1 = vld [vmem:[%s2508_s1 + $0x130] sm:$0xff]  }
  0x14   :  { %1618 = vmatprep.subr.bf16.mxu0 %v1783_v20  ;;  %v46_v60 = vld [vmem:[%s2507_s0 + $0x60] sm:$0xff]  ;;  %v47_v63 = vld [vmem:[%s2507_s0 + $0x68] sm:$0xff]  ;;  %v1809_v2 = vld [vmem:[%s2508_s1 + $0x178] sm:$0xff]  }
  0x15   :  { %1639 = vmatpush3.bf16.msra.mxu1 %v1782_v19  ;;  %v53_v61 = vpack.c.bf16 %v46_v60, %v39_v57  ;;  %v54_v0 = vpack.c.bf16 %v47_v63, %v40_v62  ;;  %v1810_v3 = vld [vmem:[%s2508_s1 + $0x138] sm:$0xff]   ;;  %v38_v4 = vld [vmem:[%s2507_s0 + $0x20] sm:$0xff] }
  0x16   :  { %1640 = vmatprep.subr.bf16.mxu1 %v1785_v22  ;;  %v45_v5 = vld [vmem:[%s2507_s0 + $0x58] sm:$0xff] }
  0x17   :  { %1619 = vmatpush3.bf16.msra.mxu0 %v1784_v21  ;;  %v52_v6 = vpack.c.bf16 %v45_v5, %v38_v4 }
  0x18   :  { %1620 = vmatprep.subr.bf16.mxu0 %v1787_v24 }
  0x19   :  { %1641 = vmatpush3.bf16.msra.mxu1 %v1786_v23 }
  0x1a   :  { %1642 = vmatprep.subr.bf16.mxu1 %v1789_v26 }
  0x1b   :  { %1621 = vmatpush3.bf16.msra.mxu0 %v1788_v25 }
  0x1c   :  { %1622 = vmatprep.subr.bf16.mxu0 %v1791_v28 }
  0x1d   :  { %1643 = vmatpush3.bf16.msra.mxu1 %v1790_v27 }
  0x1e   :  { %1644 = vmatprep.subr.bf16.mxu1 %v1793_v30 }
  0x1f   :  { %1623 = vmatpush3.bf16.msra.mxu0 %v1792_v29 }
  0x20   :  { %1652 = vmatprep.subr.bf16.mxu0 %v1795_v38 }
  0x21   :  { %1645 = vmatpush3.bf16.msra.mxu1 %v1794_v34 }
  0x22   :  { %1699 = vmatprep.subr.bf16.mxu1 %v1984_v43  ;;  %491 = vmatmul.mubr.bf16.vlgmr.msra.gmra.mrb[0].mxu0 %v48_v37 }
  0x23   :  { %1653 = vmatpush3.bf16.msra.mxu0 %v1796_v42  ;;  %572 = vmatprep.mubr.bf16.mxu0 %v53_v61 }
  0x24   :  { %532 = vmatmul.mubr.bf16.vlgmr.msra.gmra.mrb[0].mxu1 %v50_v46  ;;  %1654 = vmatprep.subr.bf16.mxu0 %v1797_v47 }
  0x25   :  { %1701 = vmatprep.mubr.msk.bf16.mxu1 %vm1985_vm0, %v1984_v43  ;;  %1700 = vmatpush3.bf16.msra.mxu1 %v1811_v56 }
  0x26   :  { %1705 = vmatprep.subr.bf16.mxu1 %v1984_v43 }
  0x27   :  { %1655 = vmatpush3.bf16.msra.mxu0 %v1798_v48 }
  0x28   :  { %1656 = vmatprep.subr.bf16.mxu0 %v1799_v49 }
  0x2b   :  { %1657 = vmatpush3.bf16.msra.mxu0 %v1800_v50 }
  0x2c   :  { %1658 = vmatprep.subr.bf16.mxu0 %v1801_v51  ;;  %1702 = vmatmul.mubr.msk.bf16.vlgmr.msra.gmra.mrb[4].mxu1 %vm454_vm1, %v54_v0 }
  0x2d   :  { %1721 = vmatprep.mubr.msk.bf16.mxu1 %vm1985_vm0, %v1984_v43 }
  0x2f   :  { %1659 = vmatpush3.bf16.msra.mxu0 %v1802_v52 }
  0x30   :  { %1660 = vmatprep.subr.bf16.mxu0 %v1803_v53 }
  0x33   :  { %1661 = vmatpush3.bf16.msra.mxu0 %v1804_v54 }
  0x34   :  { %1662 = vmatprep.subr.bf16.mxu0 %v1805_v55 }
  0x37   :  { %1663 = vmatpush3.bf16.msra.mxu0 %v1806_v58 }
  0x38   :  { %1664 = vmatprep.subr.bf16.mxu0 %v1807_v59 }
  0x3b   :  { %1665 = vmatpush3.bf16.msra.mxu0 %v1808_v1 }
  0x3c   :  { %1666 = vmatprep.subr.bf16.mxu0 %v1809_v2 }
  0x3f   :  { %1667 = vmatpush3.bf16.msra.mxu0 %v1810_v3 }
  0x40   :  { %1725 = vmatprep.subr.bf16.mxu0 %v1984_v43 }
  0x42   :  { %573 = vmatmul.mubr.bf16.vlgmr.msra.gmra.mrb[4].mxu0 %v52_v6 }
  0x43   :  { %1733 = vmatprep.mubr.msk.bf16.mxu0 %vm1985_vm0, %v1984_v43 }
  0x44   :  { %14 = vsyncpa [#allocation3], 0  ;;  %v1812_v7 = vld [vmem:[%s2510_s3] sm:$0xff]   ;;  %v1813_v8 = vld [vmem:[%s2510_s3 + $0x8] sm:$0xff]   ;;  %vm779_vm2 = vcmask 523264  }
  0x45   :  { %1706 = vmatpush3.bf16.msra.mxu1 %v1812_v7  ;;  %v1814_v9 = vld [vmem:[%s2510_s3 + $0x10] sm:$0xff]   ;;  %v1815_v10 = vld [vmem:[%s2510_s3 + $0x18] sm:$0xff]   ;;  %v1816_v11 = vld [vmem:[%s2510_s3 + $0x20] sm:$0xff]  }
  0x46   :  { %1707 = vmatprep.subr.bf16.mxu1 %v1984_v43  ;;  %v1817_v12 = vld [vmem:[%s2510_s3 + $0x28] sm:$0xff]   ;;  %v1818_v13 = vld [vmem:[%s2510_s3 + $0x30] sm:$0xff]   ;;  %v1819_v14 = vld [vmem:[%s2510_s3 + $0x38] sm:$0xff]  }
  0x47   :  { %v1820_v15 = vld [vmem:[%s2512_s5] sm:$0xff]   ;;  %v1821_v16 = vld [vmem:[%s2512_s5 + $0x8] sm:$0xff]   ;;  %v1822_v52 = vld [vmem:[%s2512_s5 + $0x10] sm:$0xff]  }
  0x48   :  { %1726 = vmatpush3.bf16.msra.mxu0 %v1820_v15  ;;  %v1486_v18 = vld [vmem:[%s2509_s2] ss:$0 sm:$0xff]  ;;  %v1823_v53 = vld [vmem:[%s2512_s5 + $0x18] sm:$0xff]   ;;  %v1829_v56 = vld [vmem:[%s2514_s7 + $0xc] ss:$28 sps:$4 sm:$0xff]  }
  0x49   :  { %1708 = vmatpush3.bf16.msra.mxu1 %v1813_v8  ;;  %1727 = vmatprep.subr.bf16.mxu0 %v1984_v43  ;;  %v1824_v54 = vld [vmem:[%s2514_s7] ss:$28 sps:$4 sm:$0xff]   ;;  %v1830_v58 = vld [vmem:[%s2514_s7 + $0x38] ss:$28 sps:$4 sm:$0xff]   ;;  %v1836_v60 = vld [vmem:[%s2514_s7 + $0x70] ss:$28 sps:$4 sm:$0xff]  }
  0x4a   :  { %1709 = vmatprep.subr.bf16.mxu1 %v1984_v43  ;;  %v1826_v55 = vld [vmem:[%s2514_s7 + $0x4] ss:$28 sps:$4 sm:$0xff]   ;;  %v1832_v57 = vld [vmem:[%s2514_s7 + $0x3c] ss:$28 sps:$4 sm:$0xff]   ;;  %v1838_v59 = vld [vmem:[%s2514_s7 + $0x74] ss:$28 sps:$4 sm:$0xff]  }
  0x4b   :  { %v1844_v61 = vld [vmem:[%s2514_s7 + $0xac] ss:$28 sps:$4 sm:$0xff]   ;;  %v1850_v63 = vld [vmem:[%s2514_s7 + $0xe4] ss:$28 sps:$4 sm:$0xff]   ;;  %v1856_v1 = vld [vmem:[%s2514_s7 + $0x11c] ss:$28 sps:$4 sm:$0xff]  }
  0x4c   :  { %1728 = vmatpush3.bf16.msra.mxu0 %v1821_v16  ;;  %v1842_v62 = vld [vmem:[%s2514_s7 + $0xa8] ss:$28 sps:$4 sm:$0xff]   ;;  %v1848_v0 = vld [vmem:[%s2514_s7 + $0xe0] ss:$28 sps:$4 sm:$0xff]   ;;  %v1854_v2 = vld [vmem:[%s2514_s7 + $0x118] ss:$28 sps:$4 sm:$0xff]  }
  0x4d   :  { %1710 = vmatpush3.bf16.msra.mxu1 %v1814_v9  ;;  %1729 = vmatprep.subr.bf16.mxu0 %v1984_v43  ;;  %v1537_v3 = vld [vmem:[%s2511_s4] ss:$0 sm:$0xff]  ;;  %v1841_v16 = vld [vmem:[%s2514_s7 + $0x7c] ss:$28 sps:$4 sm:$0xff]  }
  0x4e   :  { %1711 = vmatprep.subr.bf16.mxu1 %v1984_v43  ;;  %v1833_v15 = vld [vmem:[%s2514_s7 + $0x40] ss:$28 sps:$4 sm:$0xff]  }
  0x50   :  { %1730 = vmatpush3.bf16.msra.mxu0 %v1822_v52  ;;  %v1883_v52 = vld [vmem:[%s2514_s7 + $0x88] ss:$28 sps:$4 sm:$0xff]  }
  0x51   :  { %1712 = vmatpush3.bf16.msra.mxu1 %v1815_v10  ;;  %1731 = vmatprep.subr.bf16.mxu0 %v1984_v43 }
  0x52   :  { %1713 = vmatprep.subr.bf16.mxu1 %v1984_v43 }
  0x54   :  { %1732 = vmatpush3.bf16.msra.mxu0 %v1823_v53  ;;  %v1886_v53 = vld [vmem:[%s2514_s7 + $0xbc] ss:$28 sps:$4 sm:$0xff]  }
  0x55   :  { %1714 = vmatpush3.bf16.msra.mxu1 %v1816_v11  ;;  %1259 = vmatprep.subr.bf16.mxu0 %v1829_v56  ;;  %v1890_v56 = vld [vmem:[%s2514_s7 + $0xf4] ss:$28 sps:$4 sm:$0xff]  }
  0x56   :  { %1715 = vmatprep.subr.bf16.mxu1 %v1984_v43 }
  0x59   :  { %1716 = vmatpush3.bf16.msra.mxu1 %v1817_v12  ;;  %v1827_v12 = vld [vmem:[%s2514_s7 + $0x8] ss:$28 sps:$4 sm:$0xff]  }
  0x5a   :  { %1717 = vmatprep.subr.bf16.mxu1 %v1984_v43 }
  0x5d   :  { %1718 = vmatpush3.bf16.msra.mxu1 %v1818_v13 }
  0x5e   :  { %1719 = vmatprep.subr.bf16.mxu1 %v1984_v43 }
  0x61   :  { %1720 = vmatpush3.bf16.msra.mxu1 %v1819_v14  ;;  %v1835_v14 = vld [vmem:[%s2514_s7 + $0x44] ss:$28 sps:$4 sm:$0xff]  }
  0x62   :  { %1216 = vmatprep.subr.bf16.mxu1 %v1826_v55  ;;  %v1887_v55 = vld [vmem:[%s2514_s7 + $0xc0] ss:$28 sps:$4 sm:$0xff]  }
  0xf5   :  { %v1624_v17 = vpop.f32.mrb[0].mxu0 }
  0xf6   :  { %v1625_v19 = vpop.f32.mrb[1].mxu0 }
  0xf7   :  { %v1626_v20 = vadd.f32 %v1625_v19, %v1624_v17  ;;  %v1627_v21 = vpop.f32.mrb[2].mxu0  ;;  %v1646_v22 = vpop.f32.mrb[0].mxu1  ;;  %v1839_v17 = vld [vmem:[%s2514_s7 + $0x78] ss:$28 sps:$4 sm:$0xff]   ;;  %v1845_v19 = vld [vmem:[%s2514_s7 + $0xb0] ss:$28 sps:$4 sm:$0xff]  }
  0xf8   :  { %v1628_v23 = vpop.f32.mrb[3].mxu0  ;;  %v1647_v26 = vpop.f32.mrb[1].mxu1 }
  0xf9   :  { %v493_v24 = vadd.f32 %v1626_v20, %v1486_v18  ;;  %v1629_v25 = vadd.f32 %v1628_v23, %v1627_v21  ;;  %v1648_v27 = vadd.f32 %v1647_v26, %v1646_v22  ;;  %v1649_v28 = vpop.f32.mrb[2].mxu1  ;;  %v1853_v20 = vld [vmem:[%s2514_s7 + $0xec] ss:$28 sps:$4 sm:$0xff]   ;;  %v1859_v22 = vld [vmem:[%s2514_s7 + $0x124] ss:$28 sps:$4 sm:$0xff]  }
  0xfa   :  { %v1650_v30 = vpop.f32.mrb[3].mxu1  ;;  %v1851_v21 = vld [vmem:[%s2514_s7 + $0xe8] ss:$28 sps:$4 sm:$0xff]   ;;  %v1857_v23 = vld [vmem:[%s2514_s7 + $0x120] ss:$28 sps:$4 sm:$0xff]  }
  0xfb   :  { %v496_v29 = vadd.f32 %v1629_v25, %v1486_v18  ;;  %v534_v31 = vadd.f32 %v1648_v27, %v493_v24  ;;  %v1651_v32 = vadd.f32 %v1650_v30, %v1649_v28  ;;  %v1847_v18 = vld [vmem:[%s2514_s7 + $0xb4] ss:$28 sps:$4 sm:$0xff]   ;;  %v1865_v25 = vld [vmem:[%s2514_s7 + $0x15c] ss:$28 sps:$4 sm:$0xff]   ;;  %v1868_v28 = vld [vmem:[%s2514_s7 + $0x18c] ss:$28 sps:$4 sm:$0xff]  }
  0xfc   :  { %v1862_v24 = vld [vmem:[%s2514_s7 + $0x154] ss:$28 sps:$4 sm:$0xff]   ;;  %v1866_v30 = vld [vmem:[%s2514_s7 + $0x188] ss:$28 sps:$4 sm:$0xff]  }
  0xfd   :  { %v537_v33 = vadd.f32 %v1651_v32, %v496_v29  ;;  %v1860_v26 = vld [vmem:[%s2514_s7 + $0x150] ss:$28 sps:$4 sm:$0xff]   ;;  %v1863_v27 = vld [vmem:[%s2514_s7 + $0x158] ss:$28 sps:$4 sm:$0xff]  }
  0xfe   :  { %v1871_v29 = vld [vmem:[%s2514_s7 + $0x194] ss:$28 sps:$4 sm:$0xff]  }
  0xff   :  { %v615_v34 = vpop.f32.mrb[4].mxu1  ;;  %v1874_v32 = vld [vmem:[%s2514_s7 + $0x14] ss:$28 sps:$4 sm:$0xff]  }
 0x100   :  { %v1703_v35 = vpop.f32.mrb[5].mxu1 }
 0x101   :  { %v618_v36 = vpop.f32.mrb[6].mxu1 }
 0x102   :  { %v1704_v37 = vpop.f32.mrb[7].mxu1 }
 0x115   :  { %v1668_v38 = vpop.f32.mrb[4].mxu0 }
 0x116   :  { %v1669_v39 = vpop.f32.mrb[5].mxu0 }
 0x117   :  { %v1670_v40 = vadd.f32 %v1669_v39, %v1668_v38  ;;  %v1671_v41 = vpop.f32.mrb[6].mxu0 }
 0x118   :  { %v1672_v42 = vpop.f32.mrb[7].mxu0 }
 0x119   :  { %v575_v44 = vadd.f32 %v1670_v40, %v534_v31  ;;  %v1673_v45 = vadd.f32 %v1672_v42, %v1671_v41  ;;  %v1869_v31 = vld [vmem:[%s2514_s7 + $0x190] ss:$28 sps:$4 sm:$0xff]  }
 0x11b   :  { %v616_v46 = vadd.f32 %v615_v34, %v575_v44  ;;  %v578_v47 = vadd.f32 %v1673_v45, %v537_v33  ;;  %v1986_v33 = vmov 0   ;;  %v1546_v34 = vld [vmem:[%s2513_s6] ss:$0 sm:$0xff]  ;;  %v1872_v44 = vld [vmem:[%s2514_s7 + $0x10] ss:$28 sps:$4 sm:$0xff]  }
 0x11c   :  { %v1875_v45 = vld [vmem:[%s2514_s7 + $0x18] ss:$28 sps:$4 sm:$0xff]  }
 0x11d   :  { %v619_v48 = vadd.f32 %v618_v36, %v578_v47  ;;  %v622_v49 = vmax.f32 %v616_v46, 0.0  ;;  %v1878_v47 = vld [vmem:[%s2514_s7 + $0x4c] ss:$28 sps:$4 sm:$0xff]  }
 0x11f   :  { %v623_v50 = vmax.f32 %v619_v48, 0.0  ;;  %v1876_v48 = vld [vmem:[%s2514_s7 + $0x48] ss:$28 sps:$4 sm:$0xff]  }
 0x121   :  { %v624_v51 = vpack.c.bf16 %v623_v50, %v622_v49  ;;  %v1879_v49 = vld [vmem:[%s2514_s7 + $0x50] ss:$28 sps:$4 sm:$0xff]   ;;  %v1882_v50 = vld [vmem:[%s2514_s7 + $0x84] ss:$28 sps:$4 sm:$0xff]  }
 0x123   :  { %1722 = vmatmul.mubr.bf16.vlgmr.msra.gmra.mrb[8].mxu1 %v624_v51  ;;  %v1880_v51 = vld [vmem:[%s2514_s7 + $0x80] ss:$28 sps:$4 sm:$0xff]  }
 0x124   :  { %1217 = vmatpush1.bf16.msra.mxu1 %v1824_v54  ;;  %1248 = vmatprep.mubr.bf16.mxu1 %v1986_v33  ;;  %v1884_v54 = vld [vmem:[%s2514_s7 + $0xb8] ss:$28 sps:$4 sm:$0xff]  }
 0x125   :  { %1218 = vmatprep.subr.bf16.mxu1 %v1832_v57  ;;  %v1888_v57 = vld [vmem:[%s2514_s7 + $0xf0] ss:$28 sps:$4 sm:$0xff]  }
 0x128   :  { %1219 = vmatpush1.bf16.msra.mxu1 %v1830_v58  ;;  %v1891_v58 = vld [vmem:[%s2514_s7 + $0xf8] ss:$28 sps:$4 sm:$0xff]  }
 0x129   :  { %1220 = vmatprep.subr.bf16.mxu1 %v1838_v59  ;;  %v1894_v59 = vld [vmem:[%s2514_s7 + $0x12c] ss:$28 sps:$4 sm:$0xff]  }
 0x12c   :  { %1221 = vmatpush1.bf16.msra.mxu1 %v1836_v60  ;;  %v1892_v60 = vld [vmem:[%s2514_s7 + $0x128] ss:$28 sps:$4 sm:$0xff]  }
 0x12d   :  { %1222 = vmatprep.subr.bf16.mxu1 %v1844_v61  ;;  %v1895_v61 = vld [vmem:[%s2514_s7 + $0x130] ss:$28 sps:$4 sm:$0xff]  }
 0x130   :  { %1223 = vmatpush1.bf16.msra.mxu1 %v1842_v62  ;;  %v1898_v62 = vld [vmem:[%s2514_s7 + $0x164] ss:$28 sps:$4 sm:$0xff]  }
 0x131   :  { %1224 = vmatprep.subr.bf16.mxu1 %v1850_v63  ;;  %v1896_v63 = vld [vmem:[%s2514_s7 + $0x160] ss:$28 sps:$4 sm:$0xff]  }
 0x134   :  { %1225 = vmatpush1.bf16.msra.mxu1 %v1848_v0  ;;  %v1899_v0 = vld [vmem:[%s2514_s7 + $0x168] ss:$28 sps:$4 sm:$0xff]  }
 0x135   :  { %1226 = vmatprep.subr.bf16.mxu1 %v1856_v1  ;;  %v1902_v1 = vld [vmem:[%s2514_s7 + $0x19c] ss:$28 sps:$4 sm:$0xff]  }
 0x138   :  { %1227 = vmatpush1.bf16.msra.mxu1 %v1854_v2  ;;  %v1900_v2 = vld [vmem:[%s2514_s7 + $0x198] ss:$28 sps:$4 sm:$0xff]  }
 0x139   :  { %1228 = vmatprep.subr.bf16.mxu1 %v1862_v24 }
 0x13c   :  { %1229 = vmatpush1.bf16.msra.mxu1 %v1860_v26 }
 0x13d   :  { %1230 = vmatprep.subr.bf16.mxu1 %v1868_v28 }
 0x140   :  { %1231 = vmatpush1.bf16.msra.mxu1 %v1866_v30 }
 0x141   :  { %1302 = vmatprep.subr.bf16.mxu1 %v1874_v32 }
 0x1f6   :  { %v730_v4 = vpop.f32.mrb[8].mxu1 }
 0x1f7   :  { %v731_v5 = vadd.f32 %v1537_v3, %v730_v4  ;;  %v1723_v6 = vpop.f32.mrb[9].mxu1  ;;  %v893_v4 = vlaneseq }
 0x1f8   :  { %v733_v7 = vpop.f32.mrb[10].mxu1 }
 0x1f9   :  { %v734_v8 = vadd.f32 %v1537_v3, %v733_v7  ;;  %v1724_v9 = vpop.f32.mrb[11].mxu1  ;;  %v737_v10 = vmax.f32 %v731_v5, 0.0  ;;  %v1903_v3 = vld [vmem:[%s2514_s7 + $0x1a0] ss:$28 sps:$4 sm:$0xff]   ;;  %v2472_v5 = vshrl.u32 %v893_v4, 7  ;;  %s1987_s7 = smov [#allocation2]  }
 0x1fb   :  { %v738_v11 = vmax.f32 %v734_v8, 0.0  ;;  %v895_v6 = vsub.s32 0, %v2472_v5  ;;  %v903_v7 = vsub.s32 2, %v2472_v5  ;;  %v2479_v8 = vld [vmem:[%s2515_s8] sm:$0x7f]  ;;  %v899_v9 = vsub.s32 1, %v2472_v5 }
 0x1fc   :  { %s1475_s8 = sshll.u32 %s1987_s7, 4  ;;  %s1476_s8 = int_to_ptr.vmem [resolvable:$true] %s1475_s8 }
 0x1fd   :  { %v739_v13 = vpack.c.bf16 %v738_v11, %v737_v10  ;;  %v896_v10 = vrot.slane %v2479_v8, %v895_v6  ;;  %v904_v11 = vrot.slane %v2479_v8, %v903_v7  ;;  %s1960_s5 = scalar_lea.vmem %s1476_s8, 1792  ;;  %p1965_p1 = scmp.lt.s32.totalorder %s1476_s8, %s1476_s8 }
 0x1fe   :  { %p1961_p0 = scmp.ne.s32.totalorder %s1476_s8, %s1960_s5  ;;  %p1966_p2 = scmp.lt.s32.totalorder %s1960_s5, %s1960_s5 }
 0x1ff   :  { %1734 = vmatmul.mubr.msk.bf16.vlgmr.msra.gmra.mrb[8].mxu0 %vm779_vm2, %v739_v13 }
 0x200   :  { %1260 = vmatpush1.bf16.msra.mxu0 %v1827_v12  ;;  %1291 = vmatprep.mubr.bf16.mxu0 %v1986_v33  ;;  %v900_v12 = vrot.slane %v2479_v8, %v899_v9  ;;  %p1967_p3 = por %p1966_p2, %p1965_p1 }
 0x201   :  { %1261 = vmatprep.subr.bf16.mxu0 %v1835_v14 }
 0x202   :  { %p1968_p4 = pnand %p1967_p3, %p1961_p0 }
 0x204   :  { %1262 = vmatpush1.bf16.msra.mxu0 %v1833_v15 }
 0x205   :  { %1263 = vmatprep.subr.bf16.mxu0 %v1841_v16 }
 0x208   :  { %1264 = vmatpush1.bf16.msra.mxu0 %v1839_v17 }
 0x209   :  { %1265 = vmatprep.subr.bf16.mxu0 %v1847_v18 }
 0x20c   :  { %1266 = vmatpush1.bf16.msra.mxu0 %v1845_v19 }
 0x20d   :  { %1267 = vmatprep.subr.bf16.mxu0 %v1853_v20 }
 0x210   :  { %1268 = vmatpush1.bf16.msra.mxu0 %v1851_v21 }
 0x211   :  { %1269 = vmatprep.subr.bf16.mxu0 %v1859_v22 }
 0x214   :  { %1270 = vmatpush1.bf16.msra.mxu0 %v1857_v23 }
 0x215   :  { %1271 = vmatprep.subr.bf16.mxu0 %v1865_v25 }
 0x218   :  { %1272 = vmatpush1.bf16.msra.mxu0 %v1863_v27 }
 0x219   :  { %1273 = vmatprep.subr.bf16.mxu0 %v1871_v29 }
 0x21c   :  { %1274 = vmatpush1.bf16.msra.mxu0 %v1869_v31 }
 0x21d   :  { %1737 = vmatprep.subr.bf16.mxu0 %v1984_v43 }
 0x2d2   :  { %v817_v35 = vpop.f32.mrb[8].mxu0 }
 0x2d3   :  { %v818_v36 = vadd.f32 %v1546_v34, %v817_v35  ;;  %v1735_v37 = vpop.f32.mrb[9].mxu0 }
 0x2d4   :  { %v820_v38 = vpop.f32.mrb[10].mxu0 }
 0x2d5   :  { %v821_v39 = vadd.f32 %v1546_v34, %v820_v38  ;;  %v1736_v40 = vpop.f32.mrb[11].mxu0  ;;  %v824_v41 = vmax.f32 %v818_v36, 0.0 }
 0x2d7   :  { %v825_v42 = vmax.f32 %v821_v39, 0.0 }
 0x2d9   :  { %v826_v46 = vpack.c.bf16 %v825_v42, %v824_v41 }
 0x2db   :  { %1249 = vmatmul.mubr.bf16.vlgmr.msra.gmra.mrb[12].mxu1 %v826_v46  ;;  %1292 = vmatmul.mubr.bf16.vlgmr.msra.gmra.mrb[12].mxu0 %v826_v46 }
 0x2dc   :  { %1303 = vmatpush1.bf16.msra.mxu1 %v1872_v44  ;;  %1738 = vmatpush3.bf16.msra.mxu0 %v1875_v45 }
 0x2dd   :  { %1304 = vmatprep.subr.bf16.mxu1 %v1878_v47  ;;  %1739 = vmatprep.subr.bf16.mxu0 %v1984_v43 }
 0x2de   :  { %1334 = vmatprep.mubr.bf16.mxu1 %v1986_v33  ;;  %1753 = vmatprep.mubr.msk.bf16.mxu0 %vm1985_vm0, %v1984_v43 }
 0x2e0   :  { %1305 = vmatpush1.bf16.msra.mxu1 %v1876_v48  ;;  %1740 = vmatpush3.bf16.msra.mxu0 %v1879_v49 }
 0x2e1   :  { %1306 = vmatprep.subr.bf16.mxu1 %v1882_v50  ;;  %1741 = vmatprep.subr.bf16.mxu0 %v1984_v43 }
 0x2e4   :  { %1307 = vmatpush1.bf16.msra.mxu1 %v1880_v51  ;;  %1742 = vmatpush3.bf16.msra.mxu0 %v1883_v52 }
 0x2e5   :  { %1308 = vmatprep.subr.bf16.mxu1 %v1886_v53  ;;  %1743 = vmatprep.subr.bf16.mxu0 %v1984_v43 }
 0x2e8   :  { %1309 = vmatpush1.bf16.msra.mxu1 %v1884_v54  ;;  %1744 = vmatpush3.bf16.msra.mxu0 %v1887_v55 }
 0x2e9   :  { %1310 = vmatprep.subr.bf16.mxu1 %v1890_v56  ;;  %1745 = vmatprep.subr.bf16.mxu0 %v1984_v43 }
 0x2ec   :  { %1311 = vmatpush1.bf16.msra.mxu1 %v1888_v57  ;;  %1746 = vmatpush3.bf16.msra.mxu0 %v1891_v58 }
 0x2ed   :  { %1312 = vmatprep.subr.bf16.mxu1 %v1894_v59  ;;  %1747 = vmatprep.subr.bf16.mxu0 %v1984_v43 }
 0x2f0   :  { %1313 = vmatpush1.bf16.msra.mxu1 %v1892_v60  ;;  %1748 = vmatpush3.bf16.msra.mxu0 %v1895_v61 }
 0x2f1   :  { %1314 = vmatprep.subr.bf16.mxu1 %v1898_v62  ;;  %1749 = vmatprep.subr.bf16.mxu0 %v1984_v43 }
 0x2f4   :  { %1315 = vmatpush1.bf16.msra.mxu1 %v1896_v63  ;;  %1750 = vmatpush3.bf16.msra.mxu0 %v1899_v0  ;;  %v911_v63 = vsub.s32 4, %v2472_v5  ;;  %v919_v0 = vsub.s32 6, %v2472_v5 }
 0x2f5   :  { %1316 = vmatprep.subr.bf16.mxu1 %v1902_v1  ;;  %1751 = vmatprep.subr.bf16.mxu0 %v1984_v43  ;;  %v907_v43 = vsub.s32 3, %v2472_v5  ;;  %v915_v1 = vsub.s32 5, %v2472_v5 }
 0x2f7   :  { %v908_v13 = vrot.slane %v2479_v8, %v907_v43  ;;  %v916_v6 = vrot.slane %v2479_v8, %v915_v1 }
 0x2f8   :  { %1317 = vmatpush1.bf16.msra.mxu1 %v1900_v2  ;;  %1752 = vmatpush3.bf16.msra.mxu0 %v1903_v3  ;;  %v912_v2 = vrot.slane %v2479_v8, %v911_v63  ;;  %v920_v3 = vrot.slane %v2479_v8, %v919_v0 }
 0x2fb   :  { %1335 = vmatmul.mubr.bf16.vlgmr.msra.gmra.mrb[16].mxu1 %v826_v46  ;;  %1754 = vmatmul.mubr.bf16.vlgmr.msra.gmra.mrb[16].mxu0 %v826_v46 }
 0x3ae   :  { %v1250_v14 = vpop.f32.mrb[12].mxu1  ;;  %v1293_v15 = vpop.f32.mrb[12].mxu0 }
 0x3af   :  { %v1251_v16 = vadd.f32 %v1250_v14, %v896_v10  ;;  %v1294_v17 = vadd.f32 %v1293_v15, %v904_v11  ;;  %v1252_v18 = vpop.f32.mrb[13].mxu1  ;;  %v1295_v19 = vpop.f32.mrb[13].mxu0 }
 0x3b0   :  { %v1253_v20 = vadd.f32 %v1252_v18, %v900_v12  ;;  %v1296_v21 = vadd.f32 %v1295_v19, %v908_v13  ;;  %v1254_v22 = vpop.f32.mrb[14].mxu1  ;;  %v1297_v23 = vpop.f32.mrb[14].mxu0 }
 0x3b1   :  { %v1386_v24 = vsub.f32 0.0, %v1251_v16  ;;  %v1388_v25 = vsub.f32 0.0, %v1294_v17  ;;  %v1255_v26 = vadd.f32 %v1254_v22, %v896_v10  ;;  %v1298_v27 = vadd.f32 %v1297_v23, %v904_v11  ;;  %v1256_v28 = vpop.f32.mrb[15].mxu1  ;;  %v1299_v29 = vpop.f32.mrb[15].mxu0 }
 0x3b2   :  { %v1387_v30 = vsub.f32 0.0, %v1253_v20  ;;  %v1389_v31 = vsub.f32 0.0, %v1296_v21  ;;  %v1257_v32 = vadd.f32 %v1256_v28, %v900_v12  ;;  %v1300_v33 = vadd.f32 %v1299_v29, %v908_v13 }
 0x3b3   :  { %v1400_v34 = vmul.f32 1.442695, %v1386_v24  ;;  %v1404_v35 = vmul.f32 1.442695, %v1388_v25  ;;  %v1393_v36 = vsub.f32 0.0, %v1255_v26  ;;  %v1395_v37 = vsub.f32 0.0, %v1298_v27 }
 0x3b4   :  { %v1402_v38 = vmul.f32 1.442695, %v1387_v30  ;;  %v1406_v39 = vmul.f32 1.442695, %v1389_v31  ;;  %v1394_v40 = vsub.f32 0.0, %v1257_v32  ;;  %v1396_v41 = vsub.f32 0.0, %v1300_v33 }
 0x3b5   :  { %1904 = vpow2.f32 %v1400_v34  ;;  %v1414_v42 = vmul.f32 1.442695, %v1393_v36  ;;  %v1418_v44 = vmul.f32 1.442695, %v1395_v37 }
 0x3b6   :  { %1906 = vpow2.f32 %v1404_v35  ;;  %v1416_v45 = vmul.f32 1.442695, %v1394_v40  ;;  %v1420_v46 = vmul.f32 1.442695, %v1396_v41 }
 0x3b7   :  { %1908 = vpow2.f32 %v1402_v38 }
 0x3b8   :  { %1910 = vpow2.f32 %v1406_v39 }
 0x3b9   :  { %1912 = vpow2.f32 %v1414_v42 }
 0x3ba   :  { %1914 = vpow2.f32 %v1418_v44 }
 0x3bb   :  { %1916 = vpow2.f32 %v1416_v45 }
 0x3bc   :  { %1918 = vpow2.f32 %v1420_v46 }
 0x3bf   :  { %v1905_v47 = vpop.eup %1904 }
 0x3c0   :  { %v1907_v48 = vpop.eup %1906  ;;  %v1428_v49 = vadd.f32 1.0, %v1905_v47 }
 0x3c1   :  { %v1909_v50 = vpop.eup %1908  ;;  %v1430_v51 = vadd.f32 1.0, %v1907_v48 }
 0x3c2   :  { %v1911_v52 = vpop.eup %1910  ;;  %1920 = vrcp.f32 %v1428_v49  ;;  %v1429_v53 = vadd.f32 1.0, %v1909_v50 }
 0x3c3   :  { %v1913_v54 = vpop.eup %1912  ;;  %1922 = vrcp.f32 %v1430_v51  ;;  %v1431_v55 = vadd.f32 1.0, %v1911_v52 }
 0x3c4   :  { %v1915_v56 = vpop.eup %1914  ;;  %1924 = vrcp.f32 %v1429_v53  ;;  %v1435_v57 = vadd.f32 1.0, %v1913_v54 }
 0x3c5   :  { %v1917_v58 = vpop.eup %1916  ;;  %1926 = vrcp.f32 %v1431_v55  ;;  %v1437_v59 = vadd.f32 1.0, %v1915_v56 }
 0x3c6   :  { %v1919_v60 = vpop.eup %1918  ;;  %1928 = vrcp.f32 %v1435_v57  ;;  %v1436_v61 = vadd.f32 1.0, %v1917_v58 }
 0x3c7   :  { %1930 = vrcp.f32 %v1437_v59  ;;  %v1438_v62 = vadd.f32 1.0, %v1919_v60 }
 0x3c8   :  { %1932 = vrcp.f32 %v1436_v61 }
 0x3c9   :  { %1934 = vrcp.f32 %v1438_v62 }
 0x3cc   :  { %v1921_v4 = vpop.eup %1920 }
 0x3cd   :  { %v1923_v7 = vpop.eup %1922  ;;  %1456 = vst [vmem:[#allocation2] sm:$0xff] %v1921_v4 }
 0x3ce   :  { %v1925_v9 = vpop.eup %1924  ;;  %1458 = vst [vmem:[#allocation2 + $0x10] sm:$0xff] %v1923_v7  ;;  %v1336_v43 = vpop.f32.mrb[16].mxu1 }
 0x3cf   :  { %v1379_v10 = vpop.f32.mrb[16].mxu0  ;;  %v1927_v11 = vpop.eup %1926  ;;  %1457 = vst [vmem:[#allocation2 + $0x8] sm:$0xff] %v1925_v9  ;;  %v1337_v12 = vadd.f32 %v1336_v43, %v912_v2 }
 0x3d0   :  { %v1380_v13 = vadd.f32 %v1379_v10, %v920_v3  ;;  %v1338_v14 = vpop.f32.mrb[17].mxu1  ;;  %v1755_v5 = vpop.f32.mrb[17].mxu0  ;;  %1459 = vst [vmem:[#allocation2 + $0x18] sm:$0xff] %v1927_v11 }
 0x3d1   :  { %v1929_v15 = vpop.eup %1928  ;;  %v1339_v16 = vadd.f32 %v1338_v14, %v916_v6  ;;  %v1340_v17 = vpop.f32.mrb[18].mxu1  ;;  %v1390_v8 = vsub.f32 0.0, %v1337_v12 }
 0x3d2   :  { %v1382_v18 = vpop.f32.mrb[18].mxu0  ;;  %v1931_v19 = vpop.eup %1930  ;;  %1463 = vst [vmem:[#allocation2 + $0x38] sm:$0xff] %v1929_v15  ;;  %v1392_v20 = vsub.f32 0.0, %v1380_v13  ;;  %v1341_v21 = vadd.f32 %v1340_v17, %v912_v2 }
 0x3d3   :  { %v1383_v22 = vadd.f32 %v1382_v18, %v920_v3  ;;  %v1342_v23 = vpop.f32.mrb[19].mxu1  ;;  %v1756_v24 = vpop.f32.mrb[19].mxu0  ;;  %1465 = vst [vmem:[#allocation2 + $0x48] sm:$0xff] %v1931_v19  ;;  %v1391_v26 = vsub.f32 0.0, %v1339_v16  ;;  %v1408_v29 = vmul.f32 1.442695, %v1390_v8 }
 0x3d4   :  { %v1933_v25 = vpop.eup %1932  ;;  %v1343_v27 = vadd.f32 %v1342_v23, %v916_v6  ;;  %v1412_v30 = vmul.f32 1.442695, %v1392_v20  ;;  %v1397_v31 = vsub.f32 0.0, %v1341_v21 }
 0x3d5   :  { %v1935_v28 = vpop.eup %1934  ;;  %1464 = vst [vmem:[#allocation2 + $0x40] sm:$0xff] %v1933_v25  ;;  %v1399_v32 = vsub.f32 0.0, %v1383_v22  ;;  %v1410_v33 = vmul.f32 1.442695, %v1391_v26  ;;  %1936 = vpow2.f32 %v1408_v29 }
 0x3d6   :  { %1466 = vst [vmem:[#allocation2 + $0x50] sm:$0xff] %v1935_v28  ;;  %v1398_v34 = vsub.f32 0.0, %v1343_v27  ;;  %v1422_v35 = vmul.f32 1.442695, %v1397_v31  ;;  %1938 = vpow2.f32 %v1412_v30 }
 0x3d7   :  { %v1426_v36 = vmul.f32 1.442695, %v1399_v32  ;;  %1940 = vpow2.f32 %v1410_v33 }
 0x3d8   :  { %v1424_v37 = vmul.f32 1.442695, %v1398_v34  ;;  %1942 = vpow2.f32 %v1422_v35 }
 0x3d9   :  { %1944 = vpow2.f32 %v1426_v36 }
 0x3da   :  { %1946 = vpow2.f32 %v1424_v37 }
 0x3df   :  { %v1937_v38 = vpop.eup %1936 }
 0x3e0   :  { %v1939_v39 = vpop.eup %1938  ;;  %v1432_v40 = vadd.f32 1.0, %v1937_v38 }
 0x3e1   :  { %v1941_v41 = vpop.eup %1940  ;;  %v1434_v42 = vadd.f32 1.0, %v1939_v39 }
 0x3e2   :  { %v1943_v44 = vpop.eup %1942  ;;  %1948 = vrcp.f32 %v1432_v40  ;;  %v1433_v45 = vadd.f32 1.0, %v1941_v41 }
 0x3e3   :  { %v1945_v46 = vpop.eup %1944  ;;  %1950 = vrcp.f32 %v1434_v42  ;;  %v1439_v47 = vadd.f32 1.0, %v1943_v44 }
 0x3e4   :  { %v1947_v48 = vpop.eup %1946  ;;  %1952 = vrcp.f32 %v1433_v45  ;;  %v1441_v49 = vadd.f32 1.0, %v1945_v46 }
 0x3e5   :  { %1954 = vrcp.f32 %v1439_v47  ;;  %v1440_v50 = vadd.f32 1.0, %v1947_v48 }
 0x3e6   :  { %1956 = vrcp.f32 %v1441_v49 }
 0x3e7   :  { %1958 = vrcp.f32 %v1440_v50 }
 0x3ec   :  { %v1949_v51 = vpop.eup %1948 }
 0x3ed   :  { %v1951_v52 = vpop.eup %1950  ;;  %1460 = vst [vmem:[#allocation2 + $0x20] sm:$0xff] %v1949_v51 }
 0x3ee   :  { %v1953_v53 = vpop.eup %1952  ;;  %1462 = vst.msk [vmem:[#allocation2 + $0x30] sm:$0xff] %vm454_vm1, %v1951_v52 }
 0x3ef   :  { %v1955_v54 = vpop.eup %1954  ;;  %1461 = vst [vmem:[#allocation2 + $0x28] sm:$0xff] %v1953_v53 }
 0x3f0   :  { %v1957_v55 = vpop.eup %1956  ;;  %1467 = vst [vmem:[#allocation2 + $0x58] sm:$0xff] %v1955_v54 }
 0x3f1   :  { %v1959_v56 = vpop.eup %1958  ;;  %1469 = vst.msk [vmem:[#allocation2 + $0x68] sm:$0xff] %vm454_vm1, %v1957_v55 }
 0x3f2   :  { %1468 = vst [vmem:[#allocation2 + $0x60] sm:$0xff] %v1959_v56 }
 0x3f3   :  { %1971 = shalt.err (!%p1968_p4)
}
 0x3f4   :  { %s1972_s18 = scalar_lea.hbm %s2516_s9, 1792 }
 0x3f5   :  { %p1973_p5 = scmp.ne.s32.totalorder %s2516_s9, %s1972_s18  ;;  %p1976_p6 = scmp.lt.u32.totalorder %s1972_s18, %s2516_s9 }
 0x3f7   :  { %p1978_p7 = pnand %p1976_p6, %p1973_p5 }
 0x3f9   :  { %1981 = shalt.err (!%p1978_p7)
}
 0x3fa   :  { %s1988_s23 = smov 896   ;;  %s1989_s24 = smov 56  }
 0x3fb   :  { %1481 = dma.vmem_to_hbm [thread:$0]  %s1476_s8, 1792, %s2516_s9, [#allocation3], %s1988_s23, %s1988_s23, %s1989_s24  }
 0x3fc   :  { %1982 = dma.done.wait [#allocation3], 1792  }
 0x3fd   :  { %1983 = vsyncadd [#allocation3], 4294965504 }
 0x3fe   :  { %1485 = vsyncpa [#allocation3], 1 }

</bundles_post_ra>
